<compile_context>
chip_gen: v7x
topology: tpu7x:2x2x1
jax: 0.10.0
libtpu: 0.0.40
codegen_flags: <defaults>
</compile_context>

<pallas_src>
import jax
import jax.numpy as jnp
from jax.experimental import pallas as pl
from jax.experimental.pallas import tpu as pltpu


# ---------------------------------------------------------------------------
# Weight packing: collapse the small weight/bias tensors into one (R, 64) f32
# buffer (one DMA instead of many tiny ones).  Every band starts on an
# 8-sublane-aligned row so in-kernel slices stay tile-aligned.
# ---------------------------------------------------------------------------

_PACK_WIDTH = 64  # max lane width over all packed weights (filters_1 = 64)


def pack_weights(named_weights):
    """Pack {name: 2-D f32 array} into one (R, 64) buffer; return (buffer, layout)."""
    layout = {}
    bands = []
    row = 0
    for name, mat in named_weights.items():
        mat = jnp.asarray(mat, jnp.float32)
        r, c = mat.shape
        assert c <= _PACK_WIDTH, (name, mat.shape)
        layout[name] = (row, r, c)
        if c < _PACK_WIDTH:
            mat = jnp.concatenate(
                [mat, jnp.zeros((r, _PACK_WIDTH - c), jnp.float32)], axis=1)
        bands.append(mat)
        nxt = ((row + r + 7) // 8) * 8  # 8-row align the next band
        if nxt > row + r:
            bands.append(jnp.zeros((nxt - row - r, _PACK_WIDTH), jnp.float32))
        row = nxt
    return jnp.concatenate(bands, axis=0), layout


# ---------------------------------------------------------------------------
# Kernel (one graph pair per grid step)
# ---------------------------------------------------------------------------

def _make_kernel(layout):
    def kernel(a_ref, x_ref, m_ref, w_ref, tnw_ref, out_ref):
        f32 = jnp.float32

        def wslice(name):
            r0, r, c = layout[name]
            return w_ref[r0:r0 + r, 0:c]

        w1, b1 = wslice("w1"), wslice("b1")
        w2, b2 = wslice("w2"), wslice("b2")
        w3, b3 = wslice("w3"), wslice("b3")
        attw = wslice("attw")
        tnwb, tnb = wslice("tnwb"), wslice("tnb")
        fc1w, fc1b = wslice("fc1w"), wslice("fc1b")
        scw, scb = wslice("scw"), wslice("scb")

        a = a_ref[0]            # (2N, 2N) block-diag normalized adjacency (g1 | g2)
        x = x_ref[0]            # (2N, L)  stacked node features (zero padded)
        masks = m_ref[0]        # (4, 2N): [bin g1, bin g2, mean g1, mean g2]
        bin_m = masks[0:2, :]   # (2, 2N)
        mean_m = masks[2:4, :]  # (2, 2N)  (= bin mask / true node count)

        def gcn(h, w, b):
            # GCNConv: A_norm @ (H @ W) + b ; dropout(training=False) -> identity
            return jnp.dot(a, jnp.dot(h, w, preferred_element_type=f32),
                           preferred_element_type=f32) + b

        # One fused conv pass over both graphs (block-diag A keeps them independent;
        # padded rows only carry bias garbage and never leak into valid rows).
        h = jax.nn.relu(gcn(x, w1, b1))
        h = jax.nn.relu(gcn(h, w2, b2))
        h = gcn(h, w3, b3)                                              # (2N, F3)

        # Attention pooling for both graphs at once — all reductions on the MXU.
        means = jnp.dot(mean_m, h, preferred_element_type=f32)          # (2, F3)
        glob = jnp.tanh(jnp.dot(means, attw, preferred_element_type=f32))
        logits = jax.lax.dot_general(glob, h, (((1,), (1,)), ((), ())),
                                     preferred_element_type=f32)        # (2, 2N)
        coefs = jax.nn.sigmoid(logits) * bin_m                          # mask pads
        pooled = jnp.dot(coefs, h, preferred_element_type=f32)          # (2, F3)
        e1 = pooled[0:1, :]
        e2 = pooled[1:2, :]

        # TensorNetworkModule: scoring[t] = sum_{i,j} e1_i * W[i,j,t] * e2_j
        W = tnw_ref[...]                                                # (T, F3, F3)
        tmp = jnp.sum(W * e2[:, None, :], axis=2)                       # (T, F3)
        scoring = jax.lax.dot_general(e1, tmp, (((1,), (1,)), ((), ())),
                                      preferred_element_type=f32)       # (1, T)
        combined = jnp.concatenate([e1, e2], axis=1)                    # (1, 2*F3)
        block_scoring = jnp.dot(combined, tnwb, preferred_element_type=f32)
        scores = jax.nn.relu(scoring + block_scoring + tnb)             # (1, T)

        # fully_connected_first + scoring_layer
        hfc = jax.nn.relu(jnp.dot(scores, fc1w, preferred_element_type=f32) + fc1b)
        out = jax.nn.sigmoid(jnp.dot(hfc, scw, preferred_element_type=f32) + scb)
        out_ref[0] = out                                                # (1, 1)

    return kernel


def simgnn_forward(a_stack, x_stack, masks, packed_w, layout, tnw):
    """Batched SimGNN forward: one similarity score per graph pair."""
    B, twoN, L = x_stack.shape
    kernel = _make_kernel(layout)
    out = pl.pallas_call(
        kernel,
        out_shape=jax.ShapeDtypeStruct((B, 1, 1), jnp.float32),
        grid=(B,),
        in_specs=[
            pl.BlockSpec((1, twoN, twoN), lambda b: (b, 0, 0)),   # adjacencies
            pl.BlockSpec((1, twoN, L), lambda b: (b, 0, 0)),      # node features
            pl.BlockSpec((1, 4, twoN), lambda b: (b, 0, 0)),      # pooling masks
            pl.BlockSpec(packed_w.shape, lambda b: (0, 0)),       # packed weights
            pl.BlockSpec(tnw.shape, lambda b: (0, 0, 0)),         # NTN core tensor
        ],
        out_specs=pl.BlockSpec((1, 1, 1), lambda b: (b, 0, 0)),
        compiler_params=pltpu.CompilerParams(
            dimension_semantics=("parallel",),
            vmem_limit_bytes=32 * 1024 * 1024,
        ),
    )(a_stack, x_stack, masks, packed_w, tnw)
    return out.reshape(B)  # matches torch .view(-1) per pair


# ---------------------------------------------------------------------------
# Pure-JAX reference (per pair, unpadded) mirroring the PyTorch module.
# ---------------------------------------------------------------------------

def simgnn_reference(a1, x1, a2, x2, w1, b1, w2, b2, w3, b3,
                     attw, tnw, tnwb, tnb, fc1w, fc1b, scw, scb):
    def gcn(a, x, w, b):
        return a @ (x @ w) + b

    def conv_pass(a, x):
        h = jax.nn.relu(gcn(a, x, w1, b1))
        h = jax.nn.relu(gcn(a, h, w2, b2))
        return gcn(a, h, w3, b3)

    def attention_pool(h):
        mean = jnp.mean(h, axis=0, keepdims=True)
        glob = jnp.tanh(mean @ attw)
        coefs = jax.nn.sigmoid(jnp.sum(h * glob, axis=1, keepdims=True))
        return jnp.sum(coefs * h, axis=0, keepdims=True)

    e1 = attention_pool(conv_pass(a1, x1))
    e2 = attention_pool(conv_pass(a2, x2))
    tmp = jnp.sum(tnw * e2[:, None, :], axis=2)        # tnw is (T, F3, F3)
    scoring = e1 @ tmp.T
    combined = jnp.concatenate([e1, e2], axis=1)
    scores = jax.nn.relu(scoring + combined @ tnwb + tnb)
    hfc = jax.nn.relu(scores @ fc1w + fc1b)
    return jax.nn.sigmoid(hfc @ scw + scb).reshape(-1)


def _gcn_norm_adj_ring(n):
    """Dense normalized adjacency D^-1/2 (A+I) D^-1/2 for a ring graph."""
    idx = jnp.arange(n)
    a = jnp.zeros((n, n), jnp.float32)
    a = a.at[idx, (idx + 1) % n].set(1.0)
    a = a.at[(idx + 1) % n, idx].set(1.0)
    a_hat = a + jnp.eye(n, dtype=jnp.float32)
    deg = jnp.sum(a_hat, axis=1)
    dinv = jax.lax.rsqrt(deg)
    return dinv[:, None] * a_hat * dinv[None, :]


if __name__ == "__main__":
    # args: filters_1=64, filters_2=32, filters_3=16, tensor_neurons=16,
    #       bottle_neck_neurons=16, histogram=False, dropout=0.0 (eval mode)
    B = 8                   # graph pairs per kernel launch
    N = 16                  # max nodes per graph (padded)
    L = 8                   # number_of_labels
    F1, F2, F3 = 64, 32, 16
    T, BN = 16, 16
    twoN = 2 * N

    key = jax.random.PRNGKey(0)
    ks = jax.random.split(key, 16)

    def init(k, shape, scale=0.1):
        return scale * jax.random.normal(k, shape, jnp.float32)

    # ---- parameters (pre-transposed so every in-kernel matmul is x @ W) ----
    w1, b1 = init(ks[0], (L, F1)), init(ks[1], (1, F1))
    w2, b2 = init(ks[2], (F1, F2)), init(ks[3], (1, F2))
    w3, b3 = init(ks[4], (F2, F3)), init(ks[5], (1, F3))
    attw = init(ks[6], (F3, F3))
    tnw = jnp.transpose(init(ks[7], (F3, F3, T)), (2, 0, 1))   # (T, F3, F3)
    tnwb = init(ks[8], (T, 2 * F3)).T                          # (2*F3, T)
    tnb = init(ks[9], (1, T))
    fc1w, fc1b = init(ks[10], (T, BN)), init(ks[11], (1, BN))  # feature_count = T
    scw, scb = init(ks[12], (BN, 1)), init(ks[13], (1, 1))

    packed_w, layout = pack_weights(dict(
        w1=w1, b1=b1, w2=w2, b2=b2, w3=w3, b3=b3, attw=attw,
        tnwb=tnwb, tnb=tnb, fc1w=fc1w, fc1b=fc1b, scw=scw, scb=scb))

    # ---- a batch of graph pairs with varying node counts ----
    n1s = [16, 12, 10, 16, 8, 14, 16, 11]
    n2s = [12, 16, 9, 13, 16, 10, 15, 16]
    feat_keys = jax.random.split(ks[14], 2 * B)

    a_list, x_list, m_list, pairs = [], [], [], []
    for p in range(B):
        n1, n2 = n1s[p], n2s[p]
        a1 = _gcn_norm_adj_ring(n1)
        a2 = _gcn_norm_adj_ring(n2)
        x1 = jax.random.normal(feat_keys[2 * p], (n1, L), jnp.float32)
        x2 = jax.random.normal(feat_keys[2 * p + 1], (n2, L), jnp.float32)
        pairs.append((a1, x1, a2, x2))

        a_blk = jnp.zeros((twoN, twoN), jnp.float32)
        a_blk = a_blk.at[:n1, :n1].set(a1)
        a_blk = a_blk.at[N:N + n2, N:N + n2].set(a2)
        x_blk = jnp.zeros((twoN, L), jnp.float32)
        x_blk = x_blk.at[:n1, :].set(x1)
        x_blk = x_blk.at[N:N + n2, :].set(x2)

        r = jnp.arange(twoN)
        m1 = (r < n1).astype(jnp.float32)
        m2 = ((r >= N) & (r < N + n2)).astype(jnp.float32)
        mask = jnp.stack([m1, m2, m1 / float(n1), m2 / float(n2)], axis=0)

        a_list.append(a_blk)
        x_list.append(x_blk)
        m_list.append(mask)

    a_stack = jnp.stack(a_list)   # (B, 2N, 2N)
    x_stack = jnp.stack(x_list)   # (B, 2N, L)
    masks = jnp.stack(m_list)     # (B, 4, 2N)

    scores = jax.block_until_ready(
        simgnn_forward(a_stack, x_stack, masks, packed_w, layout, tnw))

    refs = jnp.stack([
        simgnn_reference(a1, x1, a2, x2, w1, b1, w2, b2, w3, b3,
                         attw, tnw, tnwb, tnb, fc1w, fc1b, scw, scb)[0]
        for (a1, x1, a2, x2) in pairs])

    assert scores.shape == (B,)
    assert jnp.allclose(scores, refs, atol=1e-4, rtol=1e-4), (scores, refs)
    print("KERNEL_OK")
</pallas_src>

<mosaic_0001>
module attributes {stable_mosaic.version = 11 : i64} {
  func.func @kernel(%arg0: i32, %arg1: memref<1x32x32xf32, #tpu.memory_space<vmem>>, %arg2: memref<1x32x8xf32, #tpu.memory_space<vmem>>, %arg3: memref<1x4x32xf32, #tpu.memory_space<vmem>>, %arg4: memref<232x64xf32, #tpu.memory_space<vmem>>, %arg5: memref<16x16x16xf32, #tpu.memory_space<vmem>>, %arg6: memref<1x1x1xf32, #tpu.memory_space<vmem>>) attributes {dimension_semantics = [#tpu.dimension_semantics<parallel>], iteration_bounds = array<i64: 8>, scalar_prefetch = 0 : i64, scratch_operands = 0 : i64, tpu.core_type = #tpu.core_type<tc>, window_params = [{transform_indices = @transform_0, window_bounds = array<i64: 1, 32, 32>}, {transform_indices = @transform_1, window_bounds = array<i64: 1, 32, 8>}, {transform_indices = @transform_2, window_bounds = array<i64: 1, 4, 32>}, {pipeline_mode = #tpu.pipeline_mode<synchronous>, transform_indices = @transform_3, window_bounds = array<i64: 232, 64>}, {pipeline_mode = #tpu.pipeline_mode<synchronous>, transform_indices = @transform_4, window_bounds = array<i64: 16, 16, 16>}, {transform_indices = @transform_5, window_bounds = array<i64: 1, 1, 1>}]} {
    %c0 = arith.constant 0 : index
    %c0_0 = arith.constant 0 : index
    %0 = vector.load %arg4[%c0, %c0_0] : memref<232x64xf32, #tpu.memory_space<vmem>>, vector<8x64xf32>
    %c8 = arith.constant 8 : index
    %c0_1 = arith.constant 0 : index
    %1 = vector.load %arg4[%c8, %c0_1] : memref<232x64xf32, #tpu.memory_space<vmem>>, vector<1x64xf32>
    %c16 = arith.constant 16 : index
    %c0_2 = arith.constant 0 : index
    %2 = vector.load %arg4[%c16, %c0_2] : memref<232x64xf32, #tpu.memory_space<vmem>>, vector<64x32xf32>
    %c80 = arith.constant 80 : index
    %c0_3 = arith.constant 0 : index
    %3 = vector.load %arg4[%c80, %c0_3] : memref<232x64xf32, #tpu.memory_space<vmem>>, vector<1x32xf32>
    %c88 = arith.constant 88 : index
    %c0_4 = arith.constant 0 : index
    %4 = vector.load %arg4[%c88, %c0_4] : memref<232x64xf32, #tpu.memory_space<vmem>>, vector<32x16xf32>
    %c120 = arith.constant 120 : index
    %c0_5 = arith.constant 0 : index
    %5 = vector.load %arg4[%c120, %c0_5] : memref<232x64xf32, #tpu.memory_space<vmem>>, vector<1x16xf32>
    %c128 = arith.constant 128 : index
    %c0_6 = arith.constant 0 : index
    %6 = vector.load %arg4[%c128, %c0_6] : memref<232x64xf32, #tpu.memory_space<vmem>>, vector<16x16xf32>
    %c144 = arith.constant 144 : index
    %c0_7 = arith.constant 0 : index
    %7 = vector.load %arg4[%c144, %c0_7] : memref<232x64xf32, #tpu.memory_space<vmem>>, vector<32x16xf32>
    %c176 = arith.constant 176 : index
    %c0_8 = arith.constant 0 : index
    %8 = vector.load %arg4[%c176, %c0_8] : memref<232x64xf32, #tpu.memory_space<vmem>>, vector<1x16xf32>
    %c184 = arith.constant 184 : index
    %c0_9 = arith.constant 0 : index
    %9 = vector.load %arg4[%c184, %c0_9] : memref<232x64xf32, #tpu.memory_space<vmem>>, vector<16x16xf32>
    %c200 = arith.constant 200 : index
    %c0_10 = arith.constant 0 : index
    %10 = vector.load %arg4[%c200, %c0_10] : memref<232x64xf32, #tpu.memory_space<vmem>>, vector<1x16xf32>
    %c208 = arith.constant 208 : index
    %c0_11 = arith.constant 0 : index
    %11 = vector.load %arg4[%c208, %c0_11] : memref<232x64xf32, #tpu.memory_space<vmem>>, vector<16x1xf32>
    %c224 = arith.constant 224 : index
    %c0_12 = arith.constant 0 : index
    %12 = vector.load %arg4[%c224, %c0_12] : memref<232x64xf32, #tpu.memory_space<vmem>>, vector<1x1xf32>
    %c0_13 = arith.constant 0 : index
    %c0_14 = arith.constant 0 : index
    %c0_15 = arith.constant 0 : index
    %13 = vector.load %arg1[%c0_13, %c0_14, %c0_15] : memref<1x32x32xf32, #tpu.memory_space<vmem>>, vector<1x32x32xf32>
    %14 = vector.shape_cast %13 : vector<1x32x32xf32> to vector<32x32xf32>
    %c0_16 = arith.constant 0 : index
    %c0_17 = arith.constant 0 : index
    %c0_18 = arith.constant 0 : index
    %15 = vector.load %arg2[%c0_16, %c0_17, %c0_18] : memref<1x32x8xf32, #tpu.memory_space<vmem>>, vector<1x32x8xf32>
    %16 = vector.shape_cast %15 : vector<1x32x8xf32> to vector<32x8xf32>
    %c0_19 = arith.constant 0 : index
    %c0_20 = arith.constant 0 : index
    %c0_21 = arith.constant 0 : index
    %17 = vector.load %arg3[%c0_19, %c0_20, %c0_21] : memref<1x4x32xf32, #tpu.memory_space<vmem>>, vector<1x4x32xf32>
    %18 = vector.shape_cast %17 : vector<1x4x32xf32> to vector<4x32xf32>
    %19 = vector.extract_strided_slice %18 {offsets = [0, 0], sizes = [2, 32], strides = [1, 1]} : vector<4x32xf32> to vector<2x32xf32>
    %20 = vector.extract_strided_slice %18 {offsets = [2, 0], sizes = [2, 32], strides = [1, 1]} : vector<4x32xf32> to vector<2x32xf32>
    %cst = arith.constant dense<0.000000e+00> : vector<32x64xf32>
    %21 = tpu.matmul %16, %0, %cst {dimension_numbers = #tpu.dot_dimension_numbers<[1], [0], [0], [1], [0, 0, 1, 1], [], []>} : vector<32x8xf32>, vector<8x64xf32>, vector<32x64xf32> -> vector<32x64xf32>
    %cst_22 = arith.constant dense<0.000000e+00> : vector<32x64xf32>
    %22 = tpu.matmul %14, %21, %cst_22 {dimension_numbers = #tpu.dot_dimension_numbers<[1], [0], [0], [1], [0, 0, 1, 1], [], []>} : vector<32x32xf32>, vector<32x64xf32>, vector<32x64xf32> -> vector<32x64xf32>
    %23 = vector.broadcast %1 : vector<1x64xf32> to vector<32x64xf32>
    %24 = arith.addf %22, %23 : vector<32x64xf32>
    %cst_23 = arith.constant 0.000000e+00 : f32
    %25 = vector.broadcast %cst_23 : f32 to vector<32x64xf32>
    %26 = arith.maximumf %24, %25 : vector<32x64xf32>
    %cst_24 = arith.constant dense<0.000000e+00> : vector<32x32xf32>
    %27 = tpu.matmul %26, %2, %cst_24 {dimension_numbers = #tpu.dot_dimension_numbers<[1], [0], [0], [1], [0, 0, 1, 1], [], []>} : vector<32x64xf32>, vector<64x32xf32>, vector<32x32xf32> -> vector<32x32xf32>
    %cst_25 = arith.constant dense<0.000000e+00> : vector<32x32xf32>
    %28 = tpu.matmul %14, %27, %cst_25 {dimension_numbers = #tpu.dot_dimension_numbers<[1], [0], [0], [1], [0, 0, 1, 1], [], []>} : vector<32x32xf32>, vector<32x32xf32>, vector<32x32xf32> -> vector<32x32xf32>
    %29 = vector.broadcast %3 : vector<1x32xf32> to vector<32x32xf32>
    %30 = arith.addf %28, %29 : vector<32x32xf32>
    %cst_26 = arith.constant 0.000000e+00 : f32
    %31 = vector.broadcast %cst_26 : f32 to vector<32x32xf32>
    %32 = arith.maximumf %30, %31 : vector<32x32xf32>
    %cst_27 = arith.constant dense<0.000000e+00> : vector<32x16xf32>
    %33 = tpu.matmul %32, %4, %cst_27 {dimension_numbers = #tpu.dot_dimension_numbers<[1], [0], [0], [1], [0, 0, 1, 1], [], []>} : vector<32x32xf32>, vector<32x16xf32>, vector<32x16xf32> -> vector<32x16xf32>
    %cst_28 = arith.constant dense<0.000000e+00> : vector<32x16xf32>
    %34 = tpu.matmul %14, %33, %cst_28 {dimension_numbers = #tpu.dot_dimension_numbers<[1], [0], [0], [1], [0, 0, 1, 1], [], []>} : vector<32x32xf32>, vector<32x16xf32>, vector<32x16xf32> -> vector<32x16xf32>
    %35 = vector.broadcast %5 : vector<1x16xf32> to vector<32x16xf32>
    %36 = arith.addf %34, %35 : vector<32x16xf32>
    %cst_29 = arith.constant dense<0.000000e+00> : vector<2x16xf32>
    %37 = tpu.matmul %20, %36, %cst_29 {dimension_numbers = #tpu.dot_dimension_numbers<[1], [0], [0], [1], [0, 0, 1, 1], [], []>} : vector<2x32xf32>, vector<32x16xf32>, vector<2x16xf32> -> vector<2x16xf32>
    %cst_30 = arith.constant dense<0.000000e+00> : vector<2x16xf32>
    %38 = tpu.matmul %37, %6, %cst_30 {dimension_numbers = #tpu.dot_dimension_numbers<[1], [0], [0], [1], [0, 0, 1, 1], [], []>} : vector<2x16xf32>, vector<16x16xf32>, vector<2x16xf32> -> vector<2x16xf32>
    %39 = math.tanh %38 : vector<2x16xf32>
    %cst_31 = arith.constant dense<0.000000e+00> : vector<2x32xf32>
    %40 = tpu.matmul %39, %36, %cst_31 {dimension_numbers = #tpu.dot_dimension_numbers<[1], [1], [0], [0], [0, 0, 1, 0], [], []>} : vector<2x16xf32>, vector<32x16xf32>, vector<2x32xf32> -> vector<2x32xf32>
    %41 = arith.negf %40 : vector<2x32xf32>
    %42 = math.exp %41 : vector<2x32xf32>
    %cst_32 = arith.constant 1.000000e+00 : f32
    %43 = vector.broadcast %cst_32 : f32 to vector<2x32xf32>
    %44 = arith.addf %43, %42 : vector<2x32xf32>
    %45 = arith.divf %43, %44 : vector<2x32xf32>
    %46 = arith.mulf %45, %19 : vector<2x32xf32>
    %cst_33 = arith.constant dense<0.000000e+00> : vector<2x16xf32>
    %47 = tpu.matmul %46, %36, %cst_33 {dimension_numbers = #tpu.dot_dimension_numbers<[1], [0], [0], [1], [0, 0, 1, 1], [], []>} : vector<2x32xf32>, vector<32x16xf32>, vector<2x16xf32> -> vector<2x16xf32>
    %48 = vector.extract_strided_slice %47 {offsets = [0, 0], sizes = [1, 16], strides = [1, 1]} : vector<2x16xf32> to vector<1x16xf32>
    %49 = vector.extract_strided_slice %47 {offsets = [1, 0], sizes = [1, 16], strides = [1, 1]} : vector<2x16xf32> to vector<1x16xf32>
    %c0_34 = arith.constant 0 : index
    %c0_35 = arith.constant 0 : index
    %c0_36 = arith.constant 0 : index
    %50 = vector.load %arg5[%c0_34, %c0_35, %c0_36] : memref<16x16x16xf32, #tpu.memory_space<vmem>>, vector<16x16x16xf32>
    %51 = vector.shape_cast %49 : vector<1x16xf32> to vector<1x1x16xf32>
    %52 = vector.broadcast %51 : vector<1x1x16xf32> to vector<16x16x16xf32>
    %53 = arith.mulf %50, %52 : vector<16x16x16xf32>
    %cst_37 = arith.constant dense<0.000000e+00> : vector<16x16xf32>
    %54 = vector.multi_reduction <add>, %53, %cst_37 [2] : vector<16x16x16xf32> to vector<16x16xf32>
    %cst_38 = arith.constant dense<0.000000e+00> : vector<1x16xf32>
    %55 = tpu.matmul %48, %54, %cst_38 {dimension_numbers = #tpu.dot_dimension_numbers<[1], [1], [0], [0], [0, 0, 1, 0], [], []>} : vector<1x16xf32>, vector<16x16xf32>, vector<1x16xf32> -> vector<1x16xf32>
    %56 = tpu.concatenate %48, %49 in 1 : vector<1x16xf32>, vector<1x16xf32> -> vector<1x32xf32>
    %cst_39 = arith.constant dense<0.000000e+00> : vector<1x16xf32>
    %57 = tpu.matmul %56, %7, %cst_39 {dimension_numbers = #tpu.dot_dimension_numbers<[1], [0], [0], [1], [0, 0, 1, 1], [], []>} : vector<1x32xf32>, vector<32x16xf32>, vector<1x16xf32> -> vector<1x16xf32>
    %58 = arith.addf %55, %57 : vector<1x16xf32>
    %59 = arith.addf %58, %8 : vector<1x16xf32>
    %cst_40 = arith.constant 0.000000e+00 : f32
    %60 = vector.broadcast %cst_40 : f32 to vector<1x16xf32>
    %61 = arith.maximumf %59, %60 : vector<1x16xf32>
    %cst_41 = arith.constant dense<0.000000e+00> : vector<1x16xf32>
    %62 = tpu.matmul %61, %9, %cst_41 {dimension_numbers = #tpu.dot_dimension_numbers<[1], [0], [0], [1], [0, 0, 1, 1], [], []>} : vector<1x16xf32>, vector<16x16xf32>, vector<1x16xf32> -> vector<1x16xf32>
    %63 = arith.addf %62, %10 : vector<1x16xf32>
    %cst_42 = arith.constant 0.000000e+00 : f32
    %64 = vector.broadcast %cst_42 : f32 to vector<1x16xf32>
    %65 = arith.maximumf %63, %64 : vector<1x16xf32>
    %cst_43 = arith.constant dense<0.000000e+00> : vector<1x1xf32>
    %66 = tpu.matmul %65, %11, %cst_43 {dimension_numbers = #tpu.dot_dimension_numbers<[1], [0], [0], [1], [0, 0, 1, 1], [], []>} : vector<1x16xf32>, vector<16x1xf32>, vector<1x1xf32> -> vector<1x1xf32>
    %67 = arith.addf %66, %12 : vector<1x1xf32>
    %68 = arith.negf %67 : vector<1x1xf32>
    %69 = math.exp %68 : vector<1x1xf32>
    %cst_44 = arith.constant 1.000000e+00 : f32
    %70 = vector.broadcast %cst_44 : f32 to vector<1x1xf32>
    %71 = arith.addf %70, %69 : vector<1x1xf32>
    %72 = arith.divf %70, %71 : vector<1x1xf32>
    %c0_45 = arith.constant 0 : index
    %c0_46 = arith.constant 0 : index
    %c0_47 = arith.constant 0 : index
    %73 = vector.load %arg6[%c0_45, %c0_46, %c0_47] : memref<1x1x1xf32, #tpu.memory_space<vmem>>, vector<1x1x1xf32>
    %74 = vector.shape_cast %73 : vector<1x1x1xf32> to vector<1x1xf32>
    %75 = vector.shape_cast %72 : vector<1x1xf32> to vector<1x1x1xf32>
    tpu.vector_store %arg6[%c0_45, %c0_46, %c0_47], %75 {strides = array<i32>} : memref<1x1x1xf32, #tpu.memory_space<vmem>>, vector<1x1x1xf32>,
    return
  }
  func.func @transform_0(%arg0: i32) -> (i32, i32, i32) {
    %c0_i32 = arith.constant 0 : i32
    %c0_i32_0 = arith.constant 0 : i32
    %c0_i32_1 = arith.constant 0 : i32
    return %arg0, %c0_i32, %c0_i32_0 : i32, i32, i32
  }
  func.func @transform_1(%arg0: i32) -> (i32, i32, i32) {
    %c0_i32 = arith.constant 0 : i32
    %c0_i32_0 = arith.constant 0 : i32
    %c0_i32_1 = arith.constant 0 : i32
    return %arg0, %c0_i32, %c0_i32_0 : i32, i32, i32
  }
  func.func @transform_2(%arg0: i32) -> (i32, i32, i32) {
    %c0_i32 = arith.constant 0 : i32
    %c0_i32_0 = arith.constant 0 : i32
    %c0_i32_1 = arith.constant 0 : i32
    return %arg0, %c0_i32, %c0_i32_0 : i32, i32, i32
  }
  func.func @transform_3(%arg0: i32) -> (i32, i32) {
    %c0_i32 = arith.constant 0 : i32
    %c0_i32_0 = arith.constant 0 : i32
    %c0_i32_1 = arith.constant 0 : i32
    return %c0_i32, %c0_i32_0 : i32, i32
  }
  func.func @transform_4(%arg0: i32) -> (i32, i32, i32) {
    %c0_i32 = arith.constant 0 : i32
    %c0_i32_0 = arith.constant 0 : i32
    %c0_i32_1 = arith.constant 0 : i32
    %c0_i32_2 = arith.constant 0 : i32
    return %c0_i32, %c0_i32_0, %c0_i32_1 : i32, i32, i32
  }
  func.func @transform_5(%arg0: i32) -> (i32, i32, i32) {
    %c0_i32 = arith.constant 0 : i32
    %c0_i32_0 = arith.constant 0 : i32
    %c0_i32_1 = arith.constant 0 : i32
    return %arg0, %c0_i32, %c0_i32_0 : i32, i32, i32
  }
}

</mosaic_0001>

<bundles_post_ra>
// kernel: tpu_custom_call.1
= control target key start
LH: loop header
LB: loop body
LE: loop exit
PB: predicated region body
PF: predicated region fallthrough
CT: control target
= control target key end

     0   :  { %s2386_s18 = smov 0   ;;  %s2858_s0 = inlined_call_operand.vmem [shape: f32[8,32,32], index: 0, kind: input, shape index: {}]   ;;  %s2859_s1 = inlined_call_operand.vmem [shape: f32[8,32,8], index: 1, kind: input, shape index: {}]   ;;  %s2860_s2 = inlined_call_operand.vmem [shape: f32[8,4,32], index: 2, kind: input, shape index: {}]   ;;  %s2861_s3 = inlined_call_operand.vmem [shape: f32[232,64], index: 3, kind: input, shape index: {}]   ;;  %s2862_s4 = inlined_call_operand.vmem [shape: f32[16,16,16], index: 4, kind: input, shape index: {}]   ;;  %s2863_s5 = inlined_call_operand.vmem [shape: f32[8,1,1], index: 5, kind: output, shape index: {}]  }
   0x1 LB: > { %s1939_s19 = sadd.s32 4294967295, %s2350_s18   ;;  %p1943_p0 = scmp.ge.s32.totalorder %s2350_s18, 1  ;;  %s2350_s18 = sphi %s2386_s18, %s15_s18  }
   0x2   : > { %p206_p1 = scmp.lt.s32.totalorder %s2350_s18, 9 }
   0x4   : > { %p207_p2 = pnand %p1943_p0, %p206_p1 }
   0x5   : > { %v258_v0 = vld [vmem:[%s2861_s3] sm:$0xff] (!%p207_p2)  ;;  %p241_p3 = scmp.lt.s32.totalorder (!%p207_p2), %s1939_s19, 7  ;;  %vm296_vm0 = vcmask (!%p207_p2), 64512   ;;  %vm398_vm1 = vcmask (!%p207_p2), 261120   ;;  %v260_v6 = vld [vmem:[%s2861_s3 + $0x10] sm:$0xff] (!%p207_p2)  ;;  %v261_v7 = vld [vmem:[%s2861_s3 + $0x18] sm:$0xff] (!%p207_p2) }
   0x6   : > { %210 = sbr.rel (%p207_p2) target bundleno = 3129 (0xc39), region = 40  ;;  %2077 = vmatprep.subr.mxu0 (!%p207_p2), %v258_v0  ;;  %v262_v8 = vld [vmem:[%s2861_s3 + $0x20] sm:$0xff] (!%p207_p2)  ;;  %v2243_v9 = vpack.c.bf16 (!%p207_p2), %v261_v7, %v260_v6  ;;  %v263_v10 = vld [vmem:[%s2861_s3 + $0x28] sm:$0xff] (!%p207_p2)  ;;  %v264_v12 = vld [vmem:[%s2861_s3 + $0x30] sm:$0xff] (!%p207_p2)  ;;  %vm500_vm2 = vcmask (!%p207_p2), 523264   ;;  %v2352_v7 = vmov (!%p207_p2), 0.0|0.0  }
   0x7   : > { %2078 = vmatpush3.msra.mxu0 (!%p207_p2), %v258_v0  ;;  %v2247_v11 = vpack.c.bf16 (!%p207_p2), %v263_v10, %v262_v8  ;;  %v265_v13 = vld [vmem:[%s2861_s3 + $0x38] sm:$0xff] (!%p207_p2)  ;;  %v266_v24 = vld [vmem:[%s2861_s3 + $0x40] sm:$0xff] (!%p207_p2)  ;;  %v267_v25 = vld [vmem:[%s2861_s3 + $0x48] sm:$0xff] (!%p207_p2)  ;;  %vm2353_vm3 = vmmov (!%p207_p2), 0   ;;  %v2354_v8 = vmov (!%p207_p2), 0.0   ;;  %vm951_vm4 = vcmask (!%p207_p2), 130048  }
   0x8   : > { %2244 = vmatprep.subr.bf16.mxu0 (!%p207_p2), %v2243_v9  ;;  %v2251_v14 = vpack.c.bf16 (!%p207_p2), %v265_v13, %v264_v12  ;;  %v2255_v26 = vpack.c.bf16 (!%p207_p2), %v267_v25, %v266_v24  ;;  %v1953_v27 = vld [vmem:[%s2861_s3 + $0x8] ss:$0 sm:$0xff] (!%p207_p2)  ;;  %v269_v43 = vld [vmem:[%s2861_s3 + $0x58] sm:$0xff] (!%p207_p2)  ;;  %v270_v44 = vld [vmem:[%s2861_s3 + $0x60] sm:$0xff] (!%p207_p2)  ;;  %s2355_s24 = smov (!%p207_p2), 16   ;;  %vm1477_vm6 = vcmask (!%p207_p2), 130112  }
   0x9   : > { %v2267_v48 = vpack.c.bf16 (!%p207_p2), %v270_v44, %v269_v43  ;;  %v271_v49 = vld [vmem:[%s2861_s3 + $0x68] sm:$0xff] (!%p207_p2)  ;;  %v272_v50 = vld [vmem:[%s2861_s3 + $0x70] sm:$0xff] (!%p207_p2)  ;;  %v1971_v12 = vld [vmem:[%s2861_s3 + $0x78] ss:$0 sm:$0xff] (!%p207_p2)  ;;  %vm1614_vm7 = vcmask (!%p207_p2), 1041409   ;;  %vm1616_vm8 = vcmask (!%p207_p2), 1042434  }
   0xa   : > { %v2271_v51 = vpack.c.bf16 (!%p207_p2), %v272_v50, %v271_v49  ;;  %v1962_v52 = vld [vmem:[%s2861_s3 + $0x50] ss:$0 sm:$0xff] (!%p207_p2)  ;;  %v275_v10 = vld [vmem:[%s2861_s3 + $0x88] sm:$0xff] (!%p207_p2)  ;;  %vm2512_vm5 = vmpackc.low (!%p207_p2), %vm951_vm4, %vm951_vm4  ;;  %vm1618_vm9 = vcmask (!%p207_p2), 1043459   ;;  %vm1620_vm10 = vcmask (!%p207_p2), 1044484   ;;  %vm1622_vm11 = vcmask (!%p207_p2), 1045509  }
   0xb   : > { %v1191_v43 = vld [vmem:[%s2862_s4] sm:$0xff] (!%p207_p2)  ;;  %vm1624_vm12 = vcmask (!%p207_p2), 1046534   ;;  %vm1626_vm13 = vcmask (!%p207_p2), 1047559   ;;  %vm1866_vm14 = vcmask (!%p207_p2), 0  }
   0xd   : > { %s2867_s19 = smov (!%p241_p3, %s1939_s19), 7 }
   0xe   : > { %s1994_s22 = sshll.u32 %s2867_s19, 5  ;;  %s1948_s15 = sshll.u32 %s2867_s19, 2 }
   0xf   : > { %s250_s25 = scalar_lea.vmem %s2859_s1, %s1994_s22  ;;  %s2406_s28 = scalar_lea.vmem %s2858_s0, %s1994_s22 }
  0x10   : > { %v291_v1 = vld [vmem:[%s250_s25] sm:$0xff]  ;;  %v292_v2 = vld [vmem:[%s250_s25 + $0x8] sm:$0xff]  ;;  %v293_v3 = vld [vmem:[%s250_s25 + $0x10] sm:$0xff]  ;;  %s254_s20 = scalar_lea.vmem %s2860_s2, %s1948_s15  ;;  %s257_s16 = scalar_lea.vmem %s2863_s5, %s2867_s19 }
  0x11   : > { %2079 = vmatprep.mubr.msk.f32.mxu0 %vm296_vm0, %v291_v1  ;;  %v294_v4 = vld [vmem:[%s250_s25 + $0x18] sm:$0xff]  ;;  %v287_v5 = vld [vmem:[%s2406_s28] sm:$0xff]  ;;  %v2429_v21 = vld [vmem:[%s2406_s28 + $0x8] sm:$0xff] }
  0x12   : > { %2080 = vmatmul.mubr.msk.f32.vlgmr.msra.gmra.mrb[0].mxu0 %vm296_vm0, %v292_v2  ;;  %2093 = vmatprep.mubr.msk.f32.mxu1 %vm398_vm1, %v287_v5  ;;  %v2432_v22 = vld [vmem:[%s2406_s28 + $0x10] sm:$0xff]  ;;  %v2439_v23 = vld [vmem:[%s2406_s28 + $0x18] sm:$0xff] }
  0x13   : > { %2082 = vmatprep.mubr.msk.f32.mxu0 %vm296_vm0, %v293_v3  ;;  %2246 = vmatpush3.bf16.msra.mxu0 %v2243_v9  ;;  %v274_v9 = vld [vmem:[%s2861_s3 + $0x80] sm:$0xff] }
  0x14   : > { %2248 = vmatprep.subr.bf16.mxu0 %v2247_v11 }
  0x16   : > { %2083 = vmatmul.mubr.msk.f32.gmra.mrb[2].mxu0 %vm296_vm0, %v294_v4 }
  0x17   : > { %2250 = vmatpush3.bf16.msra.mxu0 %v2247_v11  ;;  %v2290_v11 = vpack.c.bf16 %v275_v10, %v274_v9  ;;  %v1212_v10 = vld [vmem:[%s2862_s4 + $0xa8] sm:$0xff] }
  0x18   : > { %2252 = vmatprep.subr.bf16.mxu0 %v2251_v14 }
  0x1b   : > { %2254 = vmatpush3.bf16.msra.mxu0 %v2251_v14 }
  0x1c   : > { %2256 = vmatprep.subr.bf16.mxu0 %v2255_v26 }
  0x1f   : > { %2258 = vmatpush3.bf16.msra.mxu0 %v2255_v26 }
  0xe5   : > { %v2081_v15 = vpop.f32.mrb[0].mxu0 }
  0xe6   : > { %v375_v16 = vpop.f32.mrb[1].mxu0 }
  0xe7   : > { %v2235_v17 = vpack.c.bf16 %v2081_v15, %v375_v16 }
  0xe9   : > { %v2084_v18 = vpop.f32.mrb[2].mxu0  ;;  %2236 = vmatprep.subr.bf16.mxu1 %v2235_v17 }
  0xea   : > { %v385_v19 = vpop.f32.mrb[3].mxu0  ;;  %2238 = vmatpush3.bf16.msra.mxu1 %v2235_v17 }
  0xeb   : > { %v2239_v20 = vpack.c.bf16 %v2084_v18, %v385_v19 }
  0xed   : > { %2240 = vmatprep.subr.bf16.mxu1 %v2239_v20 }
  0xee   : > { %2242 = vmatpush3.bf16.msra.mxu1 %v2239_v20 }
  0xf1   : > { %2094 = vmatmul.mubr.msk.f32.vlgmr.msra.gmra.mrb[0].mxu1 %vm398_vm1, %v2429_v21 }
  0xf2   : > { %2096 = vmatprep.mubr.msk.f32.mxu1 %vm398_vm1, %v2432_v22 }
  0xf5   : > { %2097 = vmatmul.mubr.msk.f32.gmra.mrb[2].mxu1 %vm398_vm1, %v2439_v23 }
  0xf6   : > { %2129 = vmatprep.mubr.msk.f32.mxu1 %vm398_vm1, %v287_v5 }
 0x1c4   : > { %v2095_v28 = vpop.f32.mrb[0].mxu1 }
 0x1c5   : > { %v483_v29 = vadd.f32 %v2095_v28, %v1953_v27  ;;  %v477_v30 = vpop.f32.mrb[1].mxu1 }
 0x1c6   : > { %v478_v31 = vadd.f32 %v1953_v27, %v477_v30 }
 0x1c7   : > { %v497_v34 = vmax.f32 %v483_v29, 0.0 }
 0x1c8   : > { %v496_v32 = vmax.f32 %v478_v31, 0.0  ;;  %v2098_v33 = vpop.f32.mrb[2].mxu1 }
 0x1c9   : > { %v493_v35 = vadd.f32 %v2098_v33, %v1953_v27  ;;  %v487_v36 = vpop.f32.mrb[3].mxu1 }
 0x1ca   : > { %v488_v37 = vadd.f32 %v1953_v27, %v487_v36  ;;  %2115 = vmatprep.mubr.msk.f32.mxu0 %vm500_vm2, %v496_v32 }
 0x1cb   : > { %2116 = vmatmul.mubr.msk.f32.vlgmr.msra.gmra.mrb[4].mxu0 %vm500_vm2, %v497_v34  ;;  %v499_v39 = vmax.f32 %v493_v35, 0.0 }
 0x1cc   : > { %v498_v38 = vmax.f32 %v488_v37, 0.0 }
 0x1ce   : > { %2118 = vmatprep.mubr.msk.f32.mxu0 %vm500_vm2, %v498_v38  ;;  %v1223_v38 = vlaneseq }
 0x1cf   : > { %2119 = vmatmul.mubr.msk.f32.gmra.mrb[6].mxu0 %vm500_vm2, %v499_v39 }
 0x1d0   : > { %2157 = vmatprep.mubr.msk.f32.mxu0 %vm398_vm1, %v287_v5  ;;  %v2534_v39 = vshrl.u32 %v1223_v38, 7 }
 0x29e   : > { %v2117_v40 = vpop.f32.mrb[4].mxu0 }
 0x29f   : > { %v579_v41 = vpop.f32.mrb[5].mxu0 }
 0x2a0   : > { %v2259_v42 = vpack.c.bf16 %v2117_v40, %v579_v41  ;;  %v1225_v40 = vsub.s32 1, %v2534_v39 }
 0x2a2   : > { %v2120_v45 = vpop.f32.mrb[6].mxu0  ;;  %2260 = vmatprep.subr.bf16.mxu1 %v2259_v42 }
 0x2a3   : > { %v589_v46 = vpop.f32.mrb[7].mxu0  ;;  %2262 = vmatpush3.bf16.msra.mxu1 %v2259_v42  ;;  %v1193_v42 = vld [vmem:[%s2862_s4 + $0x10] sm:$0xff] }
 0x2a4   : > { %v2263_v47 = vpack.c.bf16 %v2120_v45, %v589_v46  ;;  %v1194_v46 = vld [vmem:[%s2862_s4 + $0x18] sm:$0xff] }
 0x2a6   : > { %2264 = vmatprep.subr.bf16.mxu1 %v2263_v47 }
 0x2a7   : > { %2266 = vmatpush3.bf16.msra.mxu1 %v2263_v47  ;;  %v1192_v47 = vld [vmem:[%s2862_s4 + $0x8] sm:$0xff] }
 0x2a8   : > { %2268 = vmatprep.subr.bf16.mxu1 %v2267_v48 }
 0x2aa   : > { %2130 = vmatmul.mubr.msk.f32.vlgmr.msra.gmra.mrb[4].mxu1 %vm398_vm1, %v2429_v21 }
 0x2ab   : > { %2132 = vmatprep.mubr.msk.f32.mxu1 %vm398_vm1, %v2432_v22  ;;  %2270 = vmatpush3.bf16.msra.mxu1 %v2267_v48 }
 0x2ac   : > { %2272 = vmatprep.subr.bf16.mxu1 %v2271_v51 }
 0x2ae   : > { %2133 = vmatmul.mubr.msk.f32.gmra.mrb[6].mxu1 %vm398_vm1, %v2439_v23 }
 0x2af   : > { %2274 = vmatpush3.bf16.msra.mxu1 %v2271_v51 }
 0x2b0   : > { %2283 = vmatprep.subr.bf16.mxu1 %v2352_v7 }
 0x37d   : > { %v2131_v53 = vpop.f32.mrb[4].mxu1 }
 0x37e   : > { %v674_v54 = vadd.f32 %v2131_v53, %v1962_v52  ;;  %v668_v55 = vpop.f32.mrb[5].mxu1 }
 0x37f   : > { %v669_v56 = vadd.f32 %v1962_v52, %v668_v55  ;;  %v1207_v55 = vld [vmem:[%s2862_s4 + $0x80] sm:$0xff] }
 0x380   : > { %v688_v59 = vmax.f32 %v674_v54, 0.0  ;;  %v1208_v54 = vld [vmem:[%s2862_s4 + $0x88] sm:$0xff] }
 0x381   : > { %v687_v57 = vmax.f32 %v669_v56, 0.0  ;;  %v2134_v58 = vpop.f32.mrb[6].mxu1 }
 0x382   : > { %v684_v60 = vadd.f32 %v2134_v58, %v1962_v52  ;;  %v678_v61 = vpop.f32.mrb[7].mxu1 }
 0x383   : > { %v679_v62 = vadd.f32 %v1962_v52, %v678_v61  ;;  %2143 = vmatprep.mubr.msk.f32.mxu1 %vm398_vm1, %v687_v57  ;;  %v1209_v61 = vld [vmem:[%s2862_s4 + $0x90] sm:$0xff] }
 0x384   : > { %2144 = vmatmul.mubr.msk.f32.vlgmr.msra.gmra.mrb[8].mxu1 %vm398_vm1, %v688_v59  ;;  %v690_v0 = vmax.f32 %v684_v60, 0.0  ;;  %v1210_v60 = vld [vmem:[%s2862_s4 + $0x98] sm:$0xff] }
 0x385   : > { %v689_v63 = vmax.f32 %v679_v62, 0.0 }
 0x387   : > { %2146 = vmatprep.mubr.msk.f32.mxu1 %vm398_vm1, %v689_v63 }
 0x388   : > { %2147 = vmatmul.mubr.msk.f32.gmra.mrb[10].mxu1 %vm398_vm1, %v690_v0 }
 0x389   : > { %2171 = vmatprep.mubr.msk.f32.mxu1 %vm2353_vm3, %v2354_v8 }
 0x457   : > { %v2145_v1 = vpop.f32.mrb[8].mxu1 }
 0x458   : > { %v769_v2 = vpop.f32.mrb[9].mxu1 }
 0x459   : > { %v2275_v3 = vpack.c.bf16 %v2145_v1, %v769_v2  ;;  %v1196_v2 = vld [vmem:[%s2862_s4 + $0x28] sm:$0xff] }
 0x45b   : > { %v2148_v4 = vpop.f32.mrb[10].mxu1  ;;  %2276 = vmatprep.subr.bf16.mxu0 %v2275_v3 }
 0x45c   : > { %v779_v5 = vpop.f32.mrb[11].mxu1  ;;  %2278 = vmatpush3.bf16.msra.mxu0 %v2275_v3  ;;  %v1195_v3 = vld [vmem:[%s2862_s4 + $0x20] sm:$0xff] }
 0x45d   : > { %v2279_v6 = vpack.c.bf16 %v2148_v4, %v779_v5 }
 0x45f   : > { %2280 = vmatprep.subr.bf16.mxu0 %v2279_v6 }
 0x460   : > { %2282 = vmatpush3.bf16.msra.mxu0 %v2279_v6 }
 0x461   : > { %2289 = vmatprep.subr.bf16.mxu0 %v2352_v7 }
 0x463   : > { %2158 = vmatmul.mubr.msk.f32.vlgmr.msra.gmra.mrb[8].mxu0 %vm398_vm1, %v2429_v21  ;;  %v295_v21 = vld [vmem:[%s254_s20] sm:$0xf] }
 0x464   : > { %2160 = vmatprep.mubr.msk.f32.mxu0 %vm398_vm1, %v2432_v22  ;;  %2291 = vmatpush3.bf16.msra.mxu0 %v2290_v11  ;;  %v878_v24 = vrot.slane %v295_v21, 2  ;;  %v1211_v11 = vld [vmem:[%s2862_s4 + $0xa0] sm:$0xff] }
 0x465   : > { %2300 = vmatprep.subr.bf16.mxu0 %v2352_v7 }
 0x467   : > { %2161 = vmatmul.mubr.msk.f32.gmra.mrb[10].mxu0 %vm398_vm1, %v2439_v23 }
 0x468   : > { %2178 = vmatprep.mubr.msk.f32.mxu0 %vm2353_vm3, %v2354_v8 }
 0x536   : > { %v2159_v13 = vpop.f32.mrb[8].mxu0 }
 0x537   : > { %v864_v14 = vadd.f32 %v2159_v13, %v1971_v12  ;;  %v858_v15 = vpop.f32.mrb[9].mxu0 }
 0x538   : > { %v859_v16 = vadd.f32 %v1971_v12, %v858_v15 }
 0x53a   : > { %v2284_v17 = vpack.c.bf16 %v864_v14, %v859_v16  ;;  %v2162_v18 = vpop.f32.mrb[10].mxu0  ;;  %v1198_v16 = vld [vmem:[%s2862_s4 + $0x38] sm:$0xff] }
 0x53b   : > { %v874_v19 = vadd.f32 %v2162_v18, %v1971_v12  ;;  %v868_v20 = vpop.f32.mrb[11].mxu0 }
 0x53c   : > { %v869_v22 = vadd.f32 %v1971_v12, %v868_v20  ;;  %2285 = vmatpush3.bf16.msra.mxu1 %v2284_v17 }
 0x53d   : > { %2286 = vmatprep.subr.bf16.mxu1 %v2352_v7 }
 0x53e   : > { %v2287_v23 = vpack.c.bf16 %v874_v19, %v869_v22  ;;  %v1214_v22 = vld [vmem:[%s2862_s4 + $0xb8] sm:$0xff] }
 0x540   : > { %2288 = vmatpush3.bf16.msra.mxu1 %v2287_v23 }
 0x541   : > { %2292 = vmatprep.subr.bf16.mxu1 %v2352_v7 }
 0x543   : > { %2172 = vmatmul.mubr.msk.f32.vlgmr.msra.gmra.mrb[12].mxu1 %vm398_vm1, %v878_v24 }
 0x544   : > { %2189 = vmatprep.mubr.msk.f32.mxu1 %vm2353_vm3, %v2354_v8 }
 0x549   : > { %2295 = vmatpush3.bf16.xpose.msk.msra.mxu1 %vm2512_vm5, %v2284_v17 }
 0x54a   : > { %2296 = vmatprep.subr.bf16.mxu1 %v2352_v7 }
 0x551   : > { %2299 = vmatpush3.bf16.xpose.msk.msra.mxu1 %vm2512_vm5, %v2287_v23 }
 0x552   : > { %2312 = vmatprep.subr.bf16.mxu1 %v2352_v7 }
 0x616   : > { %v947_v26 = vpop.f32.mrb[12].mxu1 }
 0x617   : > { %v2173_v27 = vpop.f32.mrb[13].mxu1  ;;  %2179 = vmatmul.mubr.msk.f32.vlgmr.msra.gmra.mrb[12].mxu0 %vm951_vm4, %v947_v26 }
 0x618   : > { %2302 = vmatpush3.bf16.msra.mxu0 %v2284_v17  ;;  %2200 = vmatprep.mubr.msk.f32.mxu0 %vm2353_vm3, %v2354_v8  ;;  %v1197_v17 = vld [vmem:[%s2862_s4 + $0x30] sm:$0xff] }
 0x619   : > { %2303 = vmatprep.subr.bf16.mxu0 %v2352_v7 }
 0x61c   : > { %2305 = vmatpush3.bf16.msra.mxu0 %v2287_v23  ;;  %v1213_v23 = vld [vmem:[%s2862_s4 + $0xb0] sm:$0xff] }
 0x61d   : > { %2306 = vmatprep.subr.bf16.mxu0 %v2352_v7 }
 0x6ea   : > { %v1021_v28 = vpop.f32.mrb[12].mxu0 }
 0x6eb   : > { %2334 = vtanh.f32 %v1021_v28  ;;  %v2180_v29 = vpop.f32.mrb[13].mxu0 }
 0x6ec   : > { %v1200_v29 = vld [vmem:[%s2862_s4 + $0x48] sm:$0xff] }
 0x6f5   : > { %v2335_v30 = vpop.eup %2334 }
 0x6f6   : > { %2190 = vmatmul.mubr.msk.f32.vlgmr.msra.gmra.mrb[14].mxu1 %vm951_vm4, %v2335_v30  ;;  %v1199_v30 = vld [vmem:[%s2862_s4 + $0x40] sm:$0xff] }
 0x6f7   : > { %2218 = vmatprep.mubr.msk.f32.mxu1 %vm2353_vm3, %v2354_v8 }
 0x7c9   : > { %v1107_v31 = vpop.f32.mrb[14].mxu1 }
 0x7ca   : > { %v1983_v32 = vmul.f32 -1.442695, %v1107_v31  ;;  %v2191_v33 = vpop.f32.mrb[15].mxu1 }
 0x7cc   : > { %2336 = vpow2.f32 %v1983_v32 }
 0x7d6   : > { %v2337_v34 = vpop.eup %2336 }
 0x7d7   : > { %v1114_v35 = vadd.f32 1.0, %v2337_v34 }
 0x7d9   : > { %2338 = vrcp.f32 %v1114_v35  ;;  %v1216_v35 = vld [vmem:[%s2862_s4 + $0xc8] sm:$0xff] }
 0x7e3   : > { %v2339_v36 = vpop.eup %2338 }
 0x7e4   : > { %v1117_v37 = vmul.f32 %v2339_v36, %v295_v21  ;;  %v1215_v36 = vld [vmem:[%s2862_s4 + $0xc0] sm:$0xff] }
 0x7e6   : > { %2201 = vmatmul.mubr.msk.f32.vlgmr.msra.gmra.mrb[14].mxu0 %vm398_vm1, %v1117_v37 }
 0x7e7   : > { %2211 = vmatprep.mubr.msk.f32.mxu0 %vm2353_vm3, %v2354_v8 }
 0x8b9   : > { %v2537_v41 = vpop.f32.mrb[14].mxu0 }
 0x8ba   : > { %v2546_v44 = vrot.slane %v2537_v41, %v1225_v40  ;;  %v2202_v45 = vpop.f32.mrb[15].mxu0 }
 0x8bb   : > { %v1202_v45 = vld [vmem:[%s2862_s4 + $0x58] sm:$0xff] }
 0x8bc   : > { %v1229_v48 = vmul.f32 %v2546_v44, %v1193_v42  ;;  %v1227_v49 = vmul.f32 %v2546_v44, %v1191_v43  ;;  %v1230_v52 = vmul.f32 %v2546_v44, %v1194_v46  ;;  %v1228_v53 = vmul.f32 %v2546_v44, %v1192_v47  ;;  %v1201_v46 = vld [vmem:[%s2862_s4 + $0x50] sm:$0xff] }
 0x8bd   : > { %v1244_v58 = vmul.f32 %v2546_v44, %v1208_v54  ;;  %v1243_v59 = vmul.f32 %v2546_v44, %v1207_v55  ;;  %v1246_v0 = vmul.f32 %v2546_v44, %v1210_v60  ;;  %v1245_v1 = vmul.f32 %v2546_v44, %v1209_v61 }
 0x8be   : > { %v1265_v50 = vsel %vm951_vm4, %v1229_v48, 0.0  ;;  %v1259_v51 = vsel %vm951_vm4, %v1227_v49, 0.0  ;;  %v1268_v56 = vsel %vm951_vm4, %v1230_v52, 0.0  ;;  %v1262_v57 = vsel %vm951_vm4, %v1228_v53, 0.0  ;;  %v1217_v52 = vld [vmem:[%s2862_s4 + $0xd0] sm:$0xff] }
 0x8bf   : > { %1266 = vadd.xlane.f32.xlu1 %v1265_v50  ;;  %1260 = vadd.xlane.f32.xlu0 %v1259_v51  ;;  %v1310_v62 = vsel %vm951_vm4, %v1244_v58, 0.0  ;;  %v1307_v63 = vsel %vm951_vm4, %v1243_v59, 0.0  ;;  %v1316_v4 = vsel %vm951_vm4, %v1246_v0, 0.0  ;;  %v1313_v5 = vsel %vm951_vm4, %v1245_v1, 0.0  ;;  %v1218_v51 = vld [vmem:[%s2862_s4 + $0xd8] sm:$0xff]  ;;  %v1203_v58 = vld [vmem:[%s2862_s4 + $0x60] sm:$0xff] }
 0x8c0   : > { %v1232_v6 = vmul.f32 %v2546_v44, %v1196_v2  ;;  %v1231_v9 = vmul.f32 %v2546_v44, %v1195_v3  ;;  %v1248_v14 = vmul.f32 %v2546_v44, %v1212_v10  ;;  %v1247_v15 = vmul.f32 %v2546_v44, %v1211_v11  ;;  %v1219_v0 = vld [vmem:[%s2862_s4 + $0xe0] sm:$0xff] }
 0x8c1   : > { %v1234_v20 = vmul.f32 %v2546_v44, %v1198_v16  ;;  %v1233_v21 = vmul.f32 %v2546_v44, %v1197_v17  ;;  %v1250_v27 = vmul.f32 %v2546_v44, %v1214_v22  ;;  %v1249_v28 = vmul.f32 %v2546_v44, %v1213_v23  ;;  %v277_v22 = vld [vmem:[%s2861_s3 + $0x98] sm:$0xff] }
 0x8c2   : > { %v1274_v12 = vsel %vm951_vm4, %v1232_v6, 0.0  ;;  %v1271_v13 = vsel %vm951_vm4, %v1231_v9, 0.0  ;;  %v1322_v18 = vsel %vm951_vm4, %v1248_v14, 0.0  ;;  %v1319_v19 = vsel %vm951_vm4, %v1247_v15, 0.0  ;;  %v1205_v6 = vld [vmem:[%s2862_s4 + $0x70] sm:$0xff] }
 0x8c3   : > { %1269 = vadd.xlane.f32.xlu1 %v1268_v56  ;;  %1263 = vadd.xlane.f32.xlu0 %v1262_v57  ;;  %v1280_v24 = vsel %vm951_vm4, %v1234_v20, 0.0  ;;  %v1277_v26 = vsel %vm951_vm4, %v1233_v21, 0.0  ;;  %v1328_v31 = vsel %vm951_vm4, %v1250_v27, 0.0  ;;  %v1325_v32 = vsel %vm951_vm4, %v1249_v28, 0.0  ;;  %v1204_v57 = vld [vmem:[%s2862_s4 + $0x68] sm:$0xff]  ;;  %v1221_v14 = vld [vmem:[%s2862_s4 + $0xf0] sm:$0xff] }
 0x8c4   : > { %v1236_v33 = vmul.f32 %v2546_v44, %v1200_v29  ;;  %v1235_v34 = vmul.f32 %v2546_v44, %v1199_v30  ;;  %v1252_v42 = vmul.f32 %v2546_v44, %v1216_v35  ;;  %v1251_v43 = vmul.f32 %v2546_v44, %v1215_v36  ;;  %v276_v21 = vld [vmem:[%s2861_s3 + $0x90] sm:$0xff] }
 0x8c5   : > { %v1238_v49 = vmul.f32 %v2546_v44, %v1202_v45  ;;  %v1237_v50 = vmul.f32 %v2546_v44, %v1201_v46  ;;  %v1254_v55 = vmul.f32 %v2546_v44, %v1218_v51  ;;  %v1253_v56 = vmul.f32 %v2546_v44, %v1217_v52 }
 0x8c6   : > { %v1286_v37 = vsel %vm951_vm4, %v1236_v33, 0.0  ;;  %v1283_v40 = vsel %vm951_vm4, %v1235_v34, 0.0  ;;  %v1334_v47 = vsel %vm951_vm4, %v1252_v42, 0.0  ;;  %v1331_v48 = vsel %vm951_vm4, %v1251_v43, 0.0 }
 0x8c7   : > { %1311 = vadd.xlane.f32.xlu1 %v1310_v62  ;;  %1308 = vadd.xlane.f32.xlu0 %v1307_v63  ;;  %v1292_v53 = vsel %vm951_vm4, %v1238_v49, 0.0  ;;  %v1289_v54 = vsel %vm951_vm4, %v1237_v50, 0.0  ;;  %v1340_v59 = vsel %vm951_vm4, %v1254_v55, 0.0  ;;  %v1337_v60 = vsel %vm951_vm4, %v1253_v56, 0.0  ;;  %v1220_v63 = vld [vmem:[%s2862_s4 + $0xe8] sm:$0xff] }
 0x8c8   : > { %v1240_v61 = vmul.f32 %v2546_v44, %v1204_v57  ;;  %v1239_v62 = vmul.f32 %v2546_v44, %v1203_v58  ;;  %v1256_v3 = vmul.f32 %v2546_v44, %v1220_v63  ;;  %v2307_v23 = vpack.c.bf16 %v277_v22, %v276_v21 }
 0x8c9   : > { %v1356_v27 = vrot.slane %v2537_v41, 1  ;;  %v1467_v50 = vand.u32 127, %v1223_v38 }
 0x8ca   : > { %v1298_v1 = vsel %vm951_vm4, %v1240_v61, 0.0  ;;  %v1295_v2 = vsel %vm951_vm4, %v1239_v62, 0.0  ;;  %v1346_v9 = vsel %vm951_vm4, %v1256_v3, 0.0  ;;  %2308 = vmatpush3.bf16.msra.mxu0 %v2307_v23 }
 0x8cb   : > { %1317 = vadd.xlane.f32.xlu1 %v1316_v4  ;;  %1314 = vadd.xlane.f32.xlu0 %v1313_v5  ;;  %v1255_v4 = vmul.f32 %v2546_v44, %v1219_v0  ;;  %v1206_v5 = vld [vmem:[%s2862_s4 + $0x78] sm:$0xff]  ;;  %v2738_v57 = vsub.s32 %v1467_v50, %v2534_v39 }
 0x8cc   : > { %v1242_v11 = vmul.f32 %v2546_v44, %v1206_v5  ;;  %2309 = vmatprep.subr.bf16.mxu0 %v2352_v7 }
 0x8cd   : > { %v1343_v10 = vsel %vm951_vm4, %v1255_v4, 0.0 }
 0x8ce   : > { %v1304_v15 = vsel %vm951_vm4, %v1242_v11, 0.0 }
 0x8cf   : > { %1275 = vadd.xlane.f32.xlu1 %v1274_v12  ;;  %1272 = vadd.xlane.f32.xlu0 %v1271_v13  ;;  %v1241_v12 = vmul.f32 %v2546_v44, %v1205_v6  ;;  %v1222_v13 = vld [vmem:[%s2862_s4 + $0xf8] sm:$0xff] }
 0x8d0   : > { %v1258_v17 = vmul.f32 %v2546_v44, %v1222_v13 }
 0x8d1   : > { %v1301_v16 = vsel %vm951_vm4, %v1241_v12, 0.0 }
 0x8d3   : > { %1323 = vadd.xlane.f32.xlu1 %v1322_v18  ;;  %1320 = vadd.xlane.f32.xlu0 %v1319_v19  ;;  %v1257_v18 = vmul.f32 %v2546_v44, %v1221_v14  ;;  %v1352_v19 = vsel %vm951_vm4, %v1258_v17, 0.0  ;;  %v278_v44 = vld [vmem:[%s2861_s3 + $0xa0] sm:$0xff] }
 0x8d5   : > { %v1349_v20 = vsel %vm951_vm4, %v1257_v18, 0.0 }
 0x8d7   : > { %1281 = vadd.xlane.f32.xlu1 %v1280_v24  ;;  %1278 = vadd.xlane.f32.xlu0 %v1277_v26  ;;  %v279_v24 = vld [vmem:[%s2861_s3 + $0xa8] sm:$0xff] }
 0x8d8   : > { %v2310_v26 = vpack.c.bf16 %v279_v24, %v278_v44 }
 0x8da   : > { %2311 = vmatpush3.bf16.msra.mxu0 %v2310_v26 }
 0x8db   : > { %1329 = vadd.xlane.f32.xlu1 %v1328_v31  ;;  %1326 = vadd.xlane.f32.xlu0 %v1325_v32 }
 0x8dc   : > { %2316 = vmatprep.subr.bf16.mxu0 %v2352_v7 }
 0x8df   : > { %1287 = vadd.xlane.f32.xlu1 %v1286_v37  ;;  %1284 = vadd.xlane.f32.xlu0 %v1283_v40 }
 0x8e3   : > { %1335 = vadd.xlane.f32.xlu1 %v1334_v47  ;;  %1332 = vadd.xlane.f32.xlu0 %v1331_v48 }
 0x8e7   : > { %1293 = vadd.xlane.f32.xlu1 %v1292_v53  ;;  %1290 = vadd.xlane.f32.xlu0 %v1289_v54  ;;  %v1472_v53 = vadd.s32 4294967288, %v1467_v50 }
 0x8e9   : > { %v2735_v56 = vsub.s32 %v1472_v53, %v2534_v39 }
 0x8eb   : > { %1341 = vadd.xlane.f32.xlu1 %v1340_v59  ;;  %1338 = vadd.xlane.f32.xlu0 %v1337_v60 }
 0x8ef   : > { %1299 = vadd.xlane.f32.xlu1 %v1298_v1  ;;  %1296 = vadd.xlane.f32.xlu0 %v1295_v2 }
 0x8f3   : > { %1347 = vadd.xlane.f32.xlu1 %v1346_v9  ;;  %1344 = vadd.xlane.f32.xlu0 %v1343_v10 }
 0x8f7   : > { %1305 = vadd.xlane.f32.xlu1 %v1304_v15  ;;  %1302 = vadd.xlane.f32.xlu0 %v1301_v16 }
 0x8fb   : > { %1353 = vadd.xlane.f32.xlu1 %v1352_v19  ;;  %1350 = vadd.xlane.f32.xlu0 %v1349_v20 }
 0x911   : > { %1357 = vrot.lane.b32.xlu0 %v1356_v27, %s2355_s24 }
 0x94c   : > { %v1267_v28 = vpop.xlane.xlu1 %1266  ;;  %v1261_v29 = vpop.xlane.xlu0 %1260 }
 0x94d   : > { %v1482_v61 = vrot.slane %v1267_v28, %v2738_v57  ;;  %v1471_v62 = vrot.slane %v1261_v29, %v2738_v57 }
 0x950   : > { %v1270_v30 = vpop.xlane.xlu1 %1269  ;;  %v1264_v31 = vpop.xlane.xlu0 %1263 }
 0x951   : > { %v1486_v38 = vrot.slane %v1270_v30, %v2735_v56  ;;  %v1476_v60 = vrot.slane %v1264_v31, %v2735_v56 }
 0x953   : > { %v1487_v6 = vsel %vm1477_vm6, %v1486_v38, %v1482_v61  ;;  %v1478_v9 = vsel %vm1477_vm6, %v1476_v60, %v1471_v62 }
 0x954   : > { %v1312_v32 = vpop.xlane.xlu1 %1311  ;;  %v1309_v33 = vpop.xlane.xlu0 %1308  ;;  %v1615_v14 = vsel %vm1614_vm7, %v1487_v6, %v1478_v9 }
 0x955   : > { %v1549_v63 = vrot.slane %v1312_v32, %v2735_v56  ;;  %v1545_v0 = vrot.slane %v1309_v33, %v2738_v57 }
 0x957   : > { %v1550_v15 = vsel %vm1477_vm6, %v1549_v63, %v1545_v0 }
 0x958   : > { %v1318_v34 = vpop.xlane.xlu1 %1317  ;;  %v1315_v35 = vpop.xlane.xlu0 %1314 }
 0x959   : > { %v1558_v39 = vrot.slane %v1318_v34, %v2735_v56  ;;  %v1554_v1 = vrot.slane %v1315_v35, %v2738_v57 }
 0x95b   : > { %v1559_v16 = vsel %vm1477_vm6, %v1558_v39, %v1554_v1 }
 0x95c   : > { %v1276_v36 = vpop.xlane.xlu1 %1275  ;;  %v1273_v37 = vpop.xlane.xlu0 %1272 }
 0x95d   : > { %v1495_v2 = vrot.slane %v1276_v36, %v2735_v56  ;;  %v1491_v3 = vrot.slane %v1273_v37, %v2738_v57 }
 0x95f   : > { %v1496_v17 = vsel %vm1477_vm6, %v1495_v2, %v1491_v3 }
 0x960   : > { %v1324_v40 = vpop.xlane.xlu1 %1323  ;;  %v1321_v42 = vpop.xlane.xlu0 %1320 }
 0x961   : > { %v1567_v10 = vrot.slane %v1324_v40, %v2735_v56  ;;  %v1563_v11 = vrot.slane %v1321_v42, %v2738_v57 }
 0x963   : > { %v1568_v44 = vsel %vm1477_vm6, %v1567_v10, %v1563_v11  ;;  %v282_v10 = vld [vmem:[%s2861_s3 + $0xc0] sm:$0xff] }
 0x964   : > { %v1282_v43 = vpop.xlane.xlu1 %1281  ;;  %v1279_v45 = vpop.xlane.xlu0 %1278 }
 0x965   : > { %v1504_v12 = vrot.slane %v1282_v43, %v2735_v56  ;;  %v1500_v13 = vrot.slane %v1279_v45, %v2738_v57 }
 0x967   : > { %v1505_v24 = vsel %vm1477_vm6, %v1504_v12, %v1500_v13  ;;  %v280_v13 = vld [vmem:[%s2861_s3 + $0xb0] sm:$0x1] }
 0x968   : > { %v2717_v46 = vpop.xlane.xlu1 %1329  ;;  %v2719_v47 = vpop.xlane.xlu0 %1326 }
 0x969   : > { %v1576_v20 = vrot.slane %v2717_v46, %v2735_v56  ;;  %v1572_v21 = vrot.slane %v2719_v47, %v2738_v57  ;;  %v1628_v46 = vsel %vm1614_vm7, %v1559_v16, %v1550_v15  ;;  %v1617_v47 = vsel %vm1616_vm8, %v1496_v17, %v1615_v14 }
 0x96a   : > { %v1619_v50 = vsel %vm1618_vm9, %v1505_v24, %v1617_v47 }
 0x96b   : > { %v1577_v40 = vsel %vm1477_vm6, %v1576_v20, %v1572_v21  ;;  %v283_v20 = vld [vmem:[%s2861_s3 + $0xc8] sm:$0x1] }
 0x96c   : > { %v2721_v48 = vpop.xlane.xlu1 %1287  ;;  %v2723_v49 = vpop.xlane.xlu0 %1284 }
 0x96d   : > { %v1513_v22 = vrot.slane %v2721_v48, %v2735_v56  ;;  %v1509_v23 = vrot.slane %v2723_v49, %v2738_v57  ;;  %v1629_v49 = vsel %vm1616_vm8, %v1568_v44, %v1628_v46 }
 0x96e   : > { %v1630_v53 = vsel %vm1618_vm9, %v1577_v40, %v1629_v49 }
 0x96f   : > { %v1514_v42 = vsel %vm1477_vm6, %v1513_v22, %v1509_v23 }
 0x970   : > { %v2726_v51 = vpop.xlane.xlu1 %1335  ;;  %v2728_v52 = vpop.xlane.xlu0 %1332 }
 0x971   : > { %v1585_v26 = vrot.slane %v2726_v51, %v2735_v56  ;;  %v1581_v27 = vrot.slane %v2728_v52, %v2738_v57 }
 0x973   : > { %v1586_v48 = vsel %vm1477_vm6, %v1585_v26, %v1581_v27 }
 0x974   : > { %v2730_v54 = vpop.xlane.xlu1 %1293  ;;  %v2732_v55 = vpop.xlane.xlu0 %1290  ;;  %v1631_v60 = vsel %vm1620_vm10, %v1586_v48, %v1630_v53 }
 0x975   : > { %v1522_v28 = vrot.slane %v2730_v54, %v2735_v56  ;;  %v1518_v29 = vrot.slane %v2732_v55, %v2738_v57  ;;  %v1621_v54 = vsel %vm1620_vm10, %v1514_v42, %v1619_v50 }
 0x977   : > { %v1523_v51 = vsel %vm1477_vm6, %v1522_v28, %v1518_v29 }
 0x978   : > { %v2740_v58 = vpop.xlane.xlu1 %1341  ;;  %v2742_v59 = vpop.xlane.xlu0 %1338  ;;  %v1623_v0 = vsel %vm1622_vm11, %v1523_v51, %v1621_v54 }
 0x979   : > { %v1594_v30 = vrot.slane %v2740_v58, %v2735_v56  ;;  %v1590_v31 = vrot.slane %v2742_v59, %v2738_v57 }
 0x97b   : > { %v1595_v52 = vsel %vm1477_vm6, %v1594_v30, %v1590_v31 }
 0x97c   : > { %v1300_v4 = vpop.xlane.xlu1 %1299  ;;  %v1297_v5 = vpop.xlane.xlu0 %1296  ;;  %v1632_v39 = vsel %vm1622_vm11, %v1595_v52, %v1631_v60 }
 0x97d   : > { %v1531_v32 = vrot.slane %v1300_v4, %v2735_v56  ;;  %v1527_v33 = vrot.slane %v1297_v5, %v2738_v57 }
 0x97f   : > { %v1532_v55 = vsel %vm1477_vm6, %v1531_v32, %v1527_v33 }
 0x980   : > { %v1348_v18 = vpop.xlane.xlu1 %1347  ;;  %v1345_v19 = vpop.xlane.xlu0 %1344  ;;  %v1625_v1 = vsel %vm1624_vm12, %v1532_v55, %v1623_v0 }
 0x981   : > { %v1603_v34 = vrot.slane %v1348_v18, %v2735_v56  ;;  %v1599_v35 = vrot.slane %v1345_v19, %v2738_v57  ;;  %v285_v18 = vld [vmem:[%s2861_s3 + $0xd8] sm:$0xff] }
 0x983   : > { %v1604_v58 = vsel %vm1477_vm6, %v1603_v34, %v1599_v35 }
 0x984   : > { %v1306_v36 = vpop.xlane.xlu1 %1305  ;;  %v1303_v37 = vpop.xlane.xlu0 %1302  ;;  %v1633_v2 = vsel %vm1624_vm12, %v1604_v58, %v1632_v39 }
 0x985   : > { %v1540_v43 = vrot.slane %v1306_v36, %v2735_v56  ;;  %v1536_v45 = vrot.slane %v1303_v37, %v2738_v57 }
 0x987   : > { %v1541_v61 = vsel %vm1477_vm6, %v1540_v43, %v1536_v45 }
 0x988   : > { %v1354_v59 = vpop.xlane.xlu1 %1353  ;;  %v1351_v38 = vpop.xlane.xlu0 %1350  ;;  %v1627_v4 = vsel %vm1626_vm13, %v1541_v61, %v1625_v1 }
 0x989   : > { %v1612_v62 = vrot.slane %v1354_v59, %v2735_v56  ;;  %v1608_v63 = vrot.slane %v1351_v38, %v2738_v57  ;;  %v281_v57 = vld [vmem:[%s2861_s3 + $0xb8] sm:$0xff] }
 0x98a   : > { %v2317_v11 = vpack.c.bf16 %v282_v10, %v281_v57 }
 0x98b   : > { %v1613_v3 = vsel %vm1477_vm6, %v1612_v62, %v1608_v63 }
 0x98c   : > { %v1634_v5 = vsel %vm1626_vm13, %v1613_v3, %v1633_v2  ;;  %v1358_v6 = vpop.permute.xlu0 %1357 }
 0x98d   : > { %v2313_v9 = vpack.c.bf16 %v1634_v5, %v1627_v4  ;;  %v1360_v56 = vsel %vm951_vm4, %v2537_v41, %v1358_v6 }
 0x98e   : > { %2212 = vmatmul.mubr.msk.f32.vlgmr.msra.gmra.mrb[16].mxu0 %vm398_vm1, %v1360_v56 }
 0x98f   : > { %2315 = vmatpush3.bf16.xpose.msk.msra.mxu1 %vm2512_vm5, %v2313_v9  ;;  %2225 = vmatprep.mubr.msk.f32.mxu0 %vm2353_vm3, %v2354_v8 }
 0x990   : > { %2318 = vmatpush3.bf16.msra.mxu0 %v2317_v11 }
 0x991   : > { %2319 = vmatprep.subr.bf16.mxu0 %v2352_v7  ;;  %v284_v7 = vld [vmem:[%s2861_s3 + $0xd0] sm:$0xff] }
 0x992   : > { %v2320_v19 = vpack.c.bf16 %v285_v18, %v284_v7 }
 0x996   : > { %2219 = vmatmul.mubr.msk.f32.vlgmr.msra.gmra.mrb[16].mxu1 %vm951_vm4, %v2537_v41 }
 0xa61   : > { %v1430_v25 = vpop.f32.mrb[16].mxu0 }
 0xa62   : > { %v2213_v12 = vpop.f32.mrb[17].mxu0 }
 0xa69   : > { %v1707_v14 = vpop.f32.mrb[16].mxu1 }
 0xa6a   : > { %v1708_v41 = vadd.f32 %v1707_v14, %v1430_v25  ;;  %v2220_v15 = vpop.f32.mrb[17].mxu1 }
 0xa6c   : > { %v1711_v16 = vadd.f32 %v1708_v41, %v280_v13 }
 0xa6e   : > { %v1712_v17 = vmax.f32 %v1711_v16, 0.0 }
 0xa70   : > { %2226 = vmatmul.mubr.msk.f32.vlgmr.msra.gmra.mrb[18].mxu0 %vm951_vm4, %v1712_v17 }
 0xa71   : > { %2232 = vmatprep.mubr.msk.f32.mxu0 %vm2353_vm3, %v2354_v8  ;;  %2321 = vmatpush3.bf16.msra.mxu0 %v2320_v19  ;;  %v286_v8 = vld [vmem:[%s2861_s3 + $0xe0] sm:$0x1] }
 0xb43   : > { %v1782_v21 = vpop.f32.mrb[18].mxu0 }
 0xb44   : > { %v1783_v22 = vadd.f32 %v1782_v21, %v283_v20  ;;  %v2227_v23 = vpop.f32.mrb[19].mxu0 }
 0xb46   : > { %v1786_v44 = vmax.f32 %v1783_v22, 0.0 }
 0xb48   : > { %2233 = vmatmul.mubr.msk.f32.vlgmr.msra.gmra.mrb[20].mxu0 %vm951_vm4, %v1786_v44 }
 0xc1b   : > { %v1856_v24 = vpop.f32.mrb[20].mxu0 }
 0xc1c   : > { %v1857_v26 = vadd.f32 %v1856_v24, %v286_v8  ;;  %v2234_v27 = vpop.f32.mrb[21].mxu0 }
 0xc1e   : > { %v1991_v28 = vmul.f32 -1.442695, %v1857_v26 }
 0xc20   : > { %2340 = vpow2.f32 %v1991_v28 }
 0xc2a   : > { %v2341_v29 = vpop.eup %2340 }
 0xc2b   : > { %v1863_v30 = vadd.f32 1.0, %v2341_v29 }
 0xc2d   : > { %2342 = vrcp.f32 %v1863_v30 }
 0xc37   : > { %v2343_v31 = vpop.eup %2342 }
 0xc38   : > { %1867 = vst.msk [vmem:[%s257_s16] sm:$0x1] %vm1866_vm14, %v2343_v31 }
 0xc39 PF: > { %s15_s18 = sadd.s32 1, %s2350_s18  }
 0xc3a   : > { %p12_p4 = scmp.ge.s32.totalorder %s15_s18, 10  }
 0xc3c   :  { %14 = sbr.rel (!%p12_p4) target bundleno = 1 (0x1), region = 76 }

</bundles_post_ra>
